<compile_context>
chip_gen: v5e
topology: v5e:2x2
jax: 0.10.0
libtpu: 0.0.40
codegen_flags: <defaults>
</compile_context>

<pallas_src>
import math
import functools

import jax
import jax.numpy as jnp
from jax import lax
from jax.experimental import pallas as pl
from jax.experimental.pallas import tpu as pltpu


def _cdiv(a: int, b: int) -> int:
    return (a + b - 1) // b


def _round_up(x: int, m: int) -> int:
    return _cdiv(x, m) * m


def _round_down(x: int, m: int) -> int:
    return max(m, (x // m) * m)


def _sublane_min(dtype) -> int:
    # Minimum second-to-last-dim tile per element width (f32:8, bf16:16, 8-bit:32).
    return {4: 8, 2: 16, 1: 32}.get(jnp.dtype(dtype).itemsize, 8)


def _vmem_capacity_bytes() -> int:
    try:
        return int(pltpu.get_tpu_info().vmem_capacity_bytes)
    except Exception:
        return 64 << 20          # conservative fallback (v7x per-core VMEM)


def _make_kernel(*, fused_mask, has_bias, use_scratch, k_tail, K, tk, cdt):
    """Grid = (M tiles, N tiles, K tiles); K (reduction) is last / "arbitrary".

    The output BlockSpec ignores k, so the (tm, tn) output tile stays resident
    in VMEM across the whole K loop (standard accumulator pattern).
    """

    def kernel(*refs):
        if use_scratch:
            *in_refs, o_ref, acc_ref = refs
        else:
            *in_refs, o_ref = refs
            acc_ref = o_ref            # accumulate straight into the f32 output tile

        it = iter(in_refs)
        x_ref = next(it)
        if fused_mask:
            w1_ref, w2_ref = next(it), next(it)
        else:
            w_ref = next(it)
        b_ref = next(it) if has_bias else None

        k = pl.program_id(2)

        @pl.when(k == 0)
        def _():
            acc_ref[...] = jnp.zeros_like(acc_ref)

        x_val = x_ref[...]
        if fused_mask:
            # Elementwise mask product on the VPU (small-M path only; for the
            # re-streamed large-M case it is precomputed once in the wrapper).
            w_val = (w1_ref[...] * w2_ref[...]).astype(cdt)
        else:
            w_val = w_ref[...]

        if k_tail:
            # Zero the K overhang of the last (clipped) K block on BOTH
            # operands: edge blocks expose stale VMEM and 0 * NaN != 0.
            col = k * tk + lax.broadcasted_iota(jnp.int32, (1, tk), 1)
            valid = col < K
            x_val = jnp.where(valid, x_val, 0)
            w_val = jnp.where(valid, w_val, 0)

        # (tm, tk) x (tn, tk) -> (tm, tn): contract the last dim of both
        # operands so the (N, K) weight tile feeds the MXU with no transpose.
        acc_ref[...] += lax.dot_general(
            x_val, w_val,
            dimension_numbers=(((1,), (1,)), ((), ())),
            preferred_element_type=jnp.float32)

        if has_bias or use_scratch:
            @pl.when(k == pl.num_programs(2) - 1)
            def _():
                res = acc_ref[...]
                if has_bias:
                    res = res + b_ref[...]          # (1, tn) broadcast over rows
                o_ref[...] = res.astype(o_ref.dtype)

    return kernel


@functools.partial(jax.jit, static_argnames=("tm", "tn", "tk", "compute_dtype"))
def spred_linear(x, weight, weight2, bias=None, bias2=None, *,
                 tm=None, tn=None, tk=None, compute_dtype=jnp.bfloat16):
    """y = x @ (weight * weight2).T  [+ bias * bias2]  (SpredLinear.forward).

    compute_dtype is the MXU operand dtype (default bf16; accumulation is
    always f32).  Pass compute_dtype=jnp.float32 (or None) for exact f32.
    """
    out_dtype = x.dtype
    M, K = x.shape
    N, K2 = weight.shape
    assert K == K2 and weight2.shape == weight.shape
    has_bias = bias is not None

    cdt = jnp.dtype(compute_dtype) if compute_dtype is not None else jnp.dtype(x.dtype)
    cdt_size = cdt.itemsize
    out_size = jnp.dtype(out_dtype).itemsize
    use_scratch = jnp.dtype(out_dtype) != jnp.dtype(jnp.float32)

    # Minimum sublane tile for the x / out blocks.
    min_m = max(_sublane_min(cdt), _sublane_min(out_dtype))

    # x is cheap relative to the weight streams: cast it once in the wrapper.
    x_c = x.astype(cdt)
    M_pad = M
    if M < min_m:
        # Tiny-M only: pad a handful of rows so no block exceeds the array
        # (everything else relies on Pallas edge-block clipping, no padding).
        x_c = jnp.pad(x_c, ((0, min_m - M), (0, 0)))
        M_pad = min_m

    # ---- tile selection -----------------------------------------------------
    auto_tm, auto_tn, auto_tk = tm is None, tn is None, tk is None
    if auto_tn:
        tn = N if N < 128 else min(512, _round_down(N, 128))
    if auto_tk:
        if K < 128:
            tk = K
        else:
            tk = min(1024, _round_down(K, 128))
            if _cdiv(K, tk) < 2 and K >= 256:
                # >= 2 K steps so the weight DMA pipelines with the MXU.
                tk = min(tk, _round_up(_cdiv(K, 2), 128))
    if auto_tm:
        tm = min(512, _round_down(M_pad, min_m))

    # Clamp (also sanitizes user-passed tiles) so blocks never exceed the array.
    tm = max(min_m, min(tm, _round_down(M_pad, min_m)))
    tn = N if N < 128 else max(128, min(tn, _round_down(N, 128)))
    tk = K if K < 128 else max(128, min(tk, _round_down(K, 128)))

    # v7x has 2 TensorCores: ensure >= 2 "parallel" tiles to shard across them.
    if _cdiv(M_pad, tm) * _cdiv(N, tn) < 2:
        if auto_tn and tn >= 256:
            tn //= 2
        elif auto_tm and tm >= 2 * min_m:
            tm = _round_down(tm // 2, min_m)

    # Re-streamed weights (>= 3 M tiles): precompute weight*weight2 once.
    precompute = _cdiv(M_pad, tm) >= 3

    # ---- generation-aware VMEM guard ---------------------------------------
    w_stream_size = cdt_size if precompute else 2 * jnp.dtype(weight.dtype).itemsize

    def footprint(tm_, tn_, tk_):
        b = 2 * tm_ * tk_ * cdt_size            # x tile     (double-buffered)
        b += 2 * tn_ * tk_ * w_stream_size      # weight stream(s)
        b += 2 * tm_ * tn_ * out_size           # output tile
        if has_bias:
            b += 2 * tn_ * 4
        if use_scratch:
            b += tm_ * tn_ * 4
        return b

    vmem_cap = _vmem_capacity_bytes()
    budget = min(int(0.8 * vmem_cap), 100 << 20)
    while footprint(tm, tn, tk) > budget:
        if tk > 128:
            tk = _round_down(tk // 2, 128)
        elif tn > 128:
            tn = _round_down(tn // 2, 128)
        elif tm > min_m:
            tm = _round_down(tm // 2, min_m)
        else:
            break

    # ---- inputs & specs ------------------------------------------------------
    inputs = [x_c]
    in_specs = [pl.BlockSpec((tm, tk), lambda i, j, k: (i, k))]      # x (M, K)
    if precompute:
        # One-shot elementwise pass (read 2NK, write NK once); the hot loop then
        # streams a single weight tensor per M tile (halves streamed weight
        # bytes, removes the per-step VPU product / vst from the kernel).
        w_eff = (weight * weight2).astype(cdt)
        inputs.append(w_eff)
        in_specs.append(pl.BlockSpec((tn, tk), lambda i, j, k: (j, k)))
    else:
        # Weights are read only once or twice: feed them in their stored dtype
        # and mask/cast inside the kernel (a wrapper cast pass would add traffic).
        inputs += [weight, weight2]
        in_specs += [pl.BlockSpec((tn, tk), lambda i, j, k: (j, k)),
                     pl.BlockSpec((tn, tk), lambda i, j, k: (j, k))]
    if has_bias:
        b_eff = (bias.astype(jnp.float32) * bias2.astype(jnp.float32)).reshape(1, N)
        inputs.append(b_eff)
        in_specs.append(pl.BlockSpec((1, tn), lambda i, j, k: (0, j)))

    scratch = [pltpu.VMEM((tm, tn), jnp.float32)] if use_scratch else []

    grid = (_cdiv(M_pad, tm), _cdiv(N, tn), _cdiv(K, tk))
    cp_kwargs = dict(dimension_semantics=("parallel", "parallel", "arbitrary"))
    fp = footprint(tm, tn, tk)
    if fp > (14 << 20):
        # Above v5e's 16 MiB scoped-VMEM default: raise the limit explicitly.
        cp_kwargs["vmem_limit_bytes"] = int(min(max(fp + (8 << 20), 32 << 20),
                                                int(0.9 * vmem_cap)))

    out = pl.pallas_call(
        _make_kernel(fused_mask=not precompute, has_bias=has_bias,
                     use_scratch=use_scratch, k_tail=(K % tk) != 0,
                     K=K, tk=tk, cdt=cdt),
        out_shape=jax.ShapeDtypeStruct((M_pad, N), out_dtype),
        grid_spec=pltpu.PrefetchScalarGridSpec(
            num_scalar_prefetch=0,
            grid=grid,
            in_specs=in_specs,
            out_specs=pl.BlockSpec((tm, tn), lambda i, j, k: (i, j)),
            scratch_shapes=scratch),
        compiler_params=pltpu.CompilerParams(**cp_kwargs),
    )(*inputs)

    if M_pad != M:
        out = out[:M]
    return out


def init_spred_linear_params(key, in_features, out_features, use_bias, dtype=jnp.float32):
    """Deterministic init mirroring the PyTorch reset_parameters()."""
    k1, k2, k3, k4 = jax.random.split(key, 4)
    # kaiming_uniform_(a=sqrt(5)) on (out, in) => bound = 1/sqrt(in_features)
    w_bound = 1.0 / math.sqrt(in_features)
    weight = jax.random.uniform(k1, (out_features, in_features), dtype, -w_bound, w_bound)
    weight2 = jax.random.uniform(k2, (out_features, in_features), dtype, -w_bound, w_bound)
    if use_bias:
        b_bound = 1.0 / math.sqrt(in_features)
        bias = jax.random.uniform(k3, (out_features,), dtype, -b_bound, b_bound)
        bias2 = jax.random.uniform(k4, (out_features,), dtype, -b_bound, b_bound)
        return weight, weight2, bias, bias2
    return weight, weight2, None, None


if __name__ == "__main__":
    key = jax.random.PRNGKey(0)
    kx, kp, kq, kr = jax.random.split(key, 4)

    def ref_fwd(x, w1, w2, b1=None, b2=None):
        y = x.astype(jnp.float32) @ (w1 * w2).astype(jnp.float32).T
        if b1 is not None:
            y = y + (b1 * b2).astype(jnp.float32)[None, :]
        return y

    # 1) bias=True, default bf16 operands (f32 accumulation), fused-mask path.
    M, K, N = 32, 256, 128
    x = jax.random.normal(kx, (M, K), jnp.float32)
    w1, w2, b1, b2 = init_spred_linear_params(kp, K, N, True)
    y = jax.block_until_ready(spred_linear(x, w1, w2, b1, b2))
    assert y.shape == (M, N) and y.dtype == x.dtype
    assert not bool(jnp.isnan(y).any())          # mirrors `assert not torch.isnan(x).any()`
    assert bool(jnp.allclose(y, ref_fwd(x, w1, w2, b1, b2), atol=5e-3, rtol=5e-2))

    # 2) exact f32 path (compute_dtype=float32), bias=False (module default).
    w1n, w2n, _, _ = init_spred_linear_params(kp, K, N, False)
    x8 = jax.random.normal(kq, (8, K), jnp.float32)
    y2 = jax.block_until_ready(spred_linear(x8, w1n, w2n, compute_dtype=jnp.float32))
    assert not bool(jnp.isnan(y2).any())
    assert bool(jnp.allclose(y2, ref_fwd(x8, w1n, w2n), atol=1e-4, rtol=1e-4))

    # 3) fully unaligned shapes (M=5, K=200, N=96): tiny-M pad, in-kernel K-tail
    #    masking and clipped edge blocks along N/K (no weight padding).
    M3, K3, N3 = 5, 200, 96
    x3 = jax.random.normal(kr, (M3, K3), jnp.float32)
    w13, w23, b13, b23 = init_spred_linear_params(kp, K3, N3, True)
    y3 = jax.block_until_ready(spred_linear(x3, w13, w23, b13, b23))
    assert y3.shape == (M3, N3)
    assert not bool(jnp.isnan(y3).any())
    assert bool(jnp.allclose(y3, ref_fwd(x3, w13, w23, b13, b23), atol=5e-3, rtol=5e-2))

    # 4) >= 3 M tiles (tm=16 forced) -> precomputed weight*weight2 single-stream path.
    M4 = 64
    x4 = jax.random.normal(kx, (M4, K), jnp.float32)
    y4 = jax.block_until_ready(spred_linear(x4, w1, w2, b1, b2, tm=16))
    assert not bool(jnp.isnan(y4).any())
    assert bool(jnp.allclose(y4, ref_fwd(x4, w1, w2, b1, b2), atol=5e-3, rtol=5e-2))

    # 5) bf16 activations -> bf16 output via the f32 scratch-accumulator path.
    x5 = jax.random.normal(kq, (16, K), jnp.bfloat16)
    y5 = jax.block_until_ready(spred_linear(x5, w1n, w2n))
    assert y5.dtype == jnp.bfloat16
    assert not bool(jnp.isnan(y5.astype(jnp.float32)).any())
    assert bool(jnp.allclose(y5.astype(jnp.float32), ref_fwd(x5, w1n, w2n),
                             atol=5e-3, rtol=5e-2))

    print("KERNEL_OK")
</pallas_src>

<mosaic_0001>
module attributes {stable_mosaic.version = 11 : i64} {
  func.func @kernel(%arg0: i32, %arg1: i32, %arg2: i32, %arg3: memref<16x128xbf16, #tpu.memory_space<vmem>>, %arg4: memref<128x128xf32, #tpu.memory_space<vmem>>, %arg5: memref<128x128xf32, #tpu.memory_space<vmem>>, %arg6: memref<1x128xf32, #tpu.memory_space<vmem>>, %arg7: memref<16x128xf32, #tpu.memory_space<vmem>>) attributes {dimension_semantics = [#tpu.dimension_semantics<parallel>, #tpu.dimension_semantics<parallel>, #tpu.dimension_semantics<arbitrary>], iteration_bounds = array<i64: 2, 1, 2>, scalar_prefetch = 0 : i64, scratch_operands = 0 : i64, tpu.core_type = #tpu.core_type<tc>, window_params = [{transform_indices = @transform_0, window_bounds = array<i64: 16, 128>}, {transform_indices = @transform_1, window_bounds = array<i64: 128, 128>}, {transform_indices = @transform_2, window_bounds = array<i64: 128, 128>}, {transform_indices = @transform_3, window_bounds = array<i64: 1, 128>}, {transform_indices = @transform_4, window_bounds = array<i64: 16, 128>}]} {
    %c0_i32 = arith.constant 0 : i32
    %0 = arith.cmpi eq, %arg2, %c0_i32 : i32
    %1 = arith.extui %0 : i1 to i32
    %c0_i32_0 = arith.constant 0 : i32
    %2 = arith.cmpi ne, %1, %c0_i32_0 : i32
    scf.if %2 {
      %cst_11 = arith.constant 0.000000e+00 : f32
      %15 = vector.broadcast %cst_11 : f32 to vector<16x128xf32>
      %c0_12 = arith.constant 0 : index
      %c0_13 = arith.constant 0 : index
      %16 = vector.load %arg7[%c0_12, %c0_13] : memref<16x128xf32, #tpu.memory_space<vmem>>, vector<16x128xf32>
      tpu.vector_store %arg7[%c0_12, %c0_13], %15 {strides = array<i32>} : memref<16x128xf32, #tpu.memory_space<vmem>>, vector<16x128xf32>,
    } else {
    }
    %c0 = arith.constant 0 : index
    %c0_1 = arith.constant 0 : index
    %3 = vector.load %arg3[%c0, %c0_1] : memref<16x128xbf16, #tpu.memory_space<vmem>>, vector<16x128xbf16>
    %c0_2 = arith.constant 0 : index
    %c0_3 = arith.constant 0 : index
    %4 = vector.load %arg4[%c0_2, %c0_3] : memref<128x128xf32, #tpu.memory_space<vmem>>, vector<128x128xf32>
    %c0_4 = arith.constant 0 : index
    %c0_5 = arith.constant 0 : index
    %5 = vector.load %arg5[%c0_4, %c0_5] : memref<128x128xf32, #tpu.memory_space<vmem>>, vector<128x128xf32>
    %6 = arith.mulf %4, %5 : vector<128x128xf32>
    %7 = arith.truncf %6 : vector<128x128xf32> to vector<128x128xbf16>
    %c0_6 = arith.constant 0 : index
    %c0_7 = arith.constant 0 : index
    %8 = vector.load %arg7[%c0_6, %c0_7] : memref<16x128xf32, #tpu.memory_space<vmem>>, vector<16x128xf32>
    %cst = arith.constant dense<0.000000e+00> : vector<16x128xf32>
    %9 = tpu.matmul %3, %7, %cst {dimension_numbers = #tpu.dot_dimension_numbers<[1], [1], [0], [0], [0, 0, 1, 0], [], []>} : vector<16x128xbf16>, vector<128x128xbf16>, vector<16x128xf32> -> vector<16x128xf32>
    %10 = arith.addf %8, %9 : vector<16x128xf32>
    %c0_8 = arith.constant 0 : index
    %c0_9 = arith.constant 0 : index
    %11 = vector.load %arg7[%c0_8, %c0_9] : memref<16x128xf32, #tpu.memory_space<vmem>>, vector<16x128xf32>
    tpu.vector_store %arg7[%c0_8, %c0_9], %10 {strides = array<i32>} : memref<16x128xf32, #tpu.memory_space<vmem>>, vector<16x128xf32>,
    %c1_i32 = arith.constant 1 : i32
    %12 = arith.cmpi eq, %arg2, %c1_i32 : i32
    %13 = arith.extui %12 : i1 to i32
    %c0_i32_10 = arith.constant 0 : i32
    %14 = arith.cmpi ne, %13, %c0_i32_10 : i32
    scf.if %14 {
      %c0_11 = arith.constant 0 : index
      %c0_12 = arith.constant 0 : index
      %15 = vector.load %arg7[%c0_11, %c0_12] : memref<16x128xf32, #tpu.memory_space<vmem>>, vector<16x128xf32>
      %c0_13 = arith.constant 0 : index
      %c0_14 = arith.constant 0 : index
      %16 = vector.load %arg6[%c0_13, %c0_14] : memref<1x128xf32, #tpu.memory_space<vmem>>, vector<1x128xf32>
      %17 = vector.broadcast %16 : vector<1x128xf32> to vector<16x128xf32>
      %18 = arith.addf %15, %17 : vector<16x128xf32>
      %c0_15 = arith.constant 0 : index
      %c0_16 = arith.constant 0 : index
      %19 = vector.load %arg7[%c0_15, %c0_16] : memref<16x128xf32, #tpu.memory_space<vmem>>, vector<16x128xf32>
      tpu.vector_store %arg7[%c0_15, %c0_16], %18 {strides = array<i32>} : memref<16x128xf32, #tpu.memory_space<vmem>>, vector<16x128xf32>,
    } else {
    }
    return
  }
  func.func @transform_0(%arg0: i32, %arg1: i32, %arg2: i32) -> (i32, i32) {
    %c0_i32 = arith.constant 0 : i32
    return %arg0, %arg2 : i32, i32
  }
  func.func @transform_1(%arg0: i32, %arg1: i32, %arg2: i32) -> (i32, i32) {
    %c0_i32 = arith.constant 0 : i32
    return %arg1, %arg2 : i32, i32
  }
  func.func @transform_2(%arg0: i32, %arg1: i32, %arg2: i32) -> (i32, i32) {
    %c0_i32 = arith.constant 0 : i32
    return %arg1, %arg2 : i32, i32
  }
  func.func @transform_3(%arg0: i32, %arg1: i32, %arg2: i32) -> (i32, i32) {
    %c0_i32 = arith.constant 0 : i32
    %c0_i32_0 = arith.constant 0 : i32
    return %c0_i32, %arg1 : i32, i32
  }
  func.func @transform_4(%arg0: i32, %arg1: i32, %arg2: i32) -> (i32, i32) {
    %c0_i32 = arith.constant 0 : i32
    return %arg0, %arg1 : i32, i32
  }
}

</mosaic_0001>

<bundles_post_ra>
// kernel: spred_linear.1
= control target key start
LH: loop header
LB: loop body
LE: loop exit
PB: predicated region body
PF: predicated region fallthrough
CT: control target
= control target key end

     0   :  { %s1320_s0 = inlined_call_operand.vmem [shape: bf16[32,256], index: 0, kind: input, shape index: {}]   ;;  %s1321_s1 = inlined_call_operand.hbm [shape: f32[128,256], index: 1, kind: input, shape index: {}]   ;;  %s1322_s2 = inlined_call_operand.hbm [shape: f32[128,256], index: 2, kind: input, shape index: {}]   ;;  %s1323_s3 = inlined_call_operand.vmem [shape: f32[1,128], index: 3, kind: input, shape index: {}]   ;;  %s1324_s4 = inlined_call_operand.hbm [shape: f32[32,128], index: 4, kind: output, shape index: {}]  }
   0x1   :  { %1334 = sst [smem:[#allocation24_spill]] %s1320_s0 }
   0x2   :  { %9 = vsyncpa [#allocation4], 0 }
   0x3   :  { %11 = vsyncpa [#allocation4 + $0x1], 0 }
   0x4   :  { %12 = vsyncpa [#allocation7], 0 }
   0x5   :  { %14 = vsyncpa [#allocation7 + $0x1], 0 }
   0x6   :  { %15 = vsyncpa [#allocation5], 0 }
   0x7   :  { %17 = vsyncpa [#allocation5 + $0x1], 0  ;;  %s1033_s15 = smov 0   ;;  %s1035_s16 = smov 0  }
   0x8   :  { %s1037_s17 = smov 0   ;;  %s1039_s18 = smov 0  }
   0x9   :  { %s1041_s19 = smov 0   ;;  %s1043_s20 = smov 0  }
   0xa   :  { %s1045_s21 = smov 0   ;;  %s1047_s22 = smov 0  }
   0xb   :  { %s1049_s23 = smov 0   ;;  %s1051_s24 = smov 0  }
   0xc   :  { %s1053_s25 = smov 0   ;;  %s1055_s26 = smov 0  }
   0xd   :  { %s1057_s27 = smov 0  }
   0xe LB: > { %1335 = sst [smem:[#allocation12_spill]] %s952_s15  ;;  %s648_s28 = sadd.s32 4294967295, %s1000_s27   ;;  %s1000_s27 = sphi %s1057_s27, %s23_s27   ;;  %s996_s26 = sphi %s1055_s26, %s1366_s26   ;;  %s992_s25 = sphi %s1053_s25, %s1365_s25   ;;  %s988_s24 = sphi %s1051_s24, %s1364_s24   ;;  %s984_s23 = sphi %s1049_s23, %s1363_s23   ;;  %s980_s22 = sphi %s1047_s22, %s1362_s22   ;;  %s976_s21 = sphi %s1045_s21, %s1361_s21   ;;  %s972_s20 = sphi %s1043_s20, %s1360_s20   ;;  %s968_s19 = sphi %s1041_s19, %s1370_s19   ;;  %s964_s18 = sphi %s1039_s18, %s1369_s18   ;;  %s960_s17 = sphi %s1037_s17, %s1358_s17   ;;  %s956_s16 = sphi %s1035_s16, %s1368_s16   ;;  %s952_s15 = sphi %s1033_s15, %s1367_s15  }
   0xf   : > { %1336 = sst [smem:[#allocation13_spill]] %s960_s17  ;;  %s35_s30 = sadd.s32 1, %s992_s25 }
  0x10   : > { %1337 = sst [smem:[#allocation14_spill]] %s972_s20  ;;  %s42_s5 = sadd.s32 1, %s996_s26 }
  0x11   : > { %1338 = sst [smem:[#allocation15_spill]] %s980_s22  ;;  %p36_p0 = scmp.ge.s32.totalorder %s35_s30, 2 }
  0x12   : > { %1339 = sst [smem:[#allocation16_spill]] %s992_s25  ;;  %s51_s6 = sadd.s32 1, %s980_s22 }
  0x13   : > { %1340 = sst [smem:[#allocation17_spill]] %s996_s26  ;;  %p58_p1 = scmp.ne.s32.totalorder %s980_s22, %s976_s21 }
  0x14   : > { %p59_p2 = scmp.eq.s32.totalorder %s1000_s27, 0  ;;  %s1372_s30 = smov (%p36_p0, %s35_s30), 0 }
  0x15   : > { %1341 = sst [smem:[#allocation18_spill]] %s1372_s30  ;;  %s1374_s5 = smov (!%p36_p0, %s42_s5), %s996_s26 }
  0x16   : > { %s47_s7 = ssub.s32 %s992_s25, %s1372_s30  ;;  %p1111_p3 = por %p59_p2, %p58_p1 }
  0x17   : > { %p44_p4 = scmp.ge.s32.totalorder %s1374_s5, 2  ;;  %p77_p5 = scmp.eq.s32.totalorder %s47_s7, 0 }
  0x18   : > { %s79_s9 = sadd.s32 1, %s972_s20  ;;  %p86_p6 = scmp.ne.s32.totalorder %s972_s20, %s968_s19 }
  0x19   : > { %s1376_s5 = smov (%p44_p4, %s1374_s5), 0  ;;  %p92_p8 = scmp.ne.s32.totalorder %s968_s19, %s964_s18 }
  0x1a   : > { %1343 = sst [smem:[#allocation19_spill]] %s1376_s5  ;;  %s46_s11 = ssub.s32 %s996_s26, %s1376_s5 }
  0x1b   : > { %s1121_s10 = scalar_select %p77_p5, %s972_s20, %s79_s9  }
  0x1c   : > { %p1125_p7 = por %p86_p6, %p59_p2  ;;  %s48_s13 = sor.u32 %s47_s7, %s46_s11 }
  0x1d   : > { %1344 = sst [smem:[#allocation20_spill]] %s1121_s10  ;;  %p49_p9 = scmp.eq.s32.totalorder %s48_s13, 0 }
  0x1e   : > { %p93_p10 = scmp.eq.s32.totalorder %s648_s28, 0  ;;  %p159_p11 = scmp.eq.s32.totalorder %s46_s11, 0 }
  0x1f   : > { %s161_s14 = sadd.s32 1, %s960_s17  ;;  %p171_p13 = scmp.ne.s32.totalorder %s960_s17, %s956_s16 }
  0x20   : > { %s1135_s29 = scalar_select %p49_p9, %s980_s22, %s51_s6  }
  0x21   : > { %p1137_p12 = por %p93_p10, %p92_p8  ;;  %p172_p0 = scmp.eq.s32.totalorder %s648_s28, 3 }
  0x22   : > { %1346 = sst [smem:[#allocation21_spill]] %s1135_s29  ;;  %p177_p1 = scmp.ne.s32.totalorder %s956_s16, %s952_s15 }
  0x23   : > { %s1144_s9 = scalar_select %p159_p11, %s960_s17, %s161_s14  }
  0x24   : > { %s1349_s5 = sadd.s32 4294967294, %s1000_s27   ;;  %p1152_p4 = por %p172_p0, %p171_p13 }
  0x25   : > { %1348 = sst [smem:[#allocation22_spill]] %s1144_s9  ;;  %p178_p2 = scmp.eq.s32.totalorder %s1349_s5, 3 }
  0x26   : > { %p652_p6 = scmp.ge.s32.totalorder %s1000_s27, 4 }
  0x27   : > { %p1156_p5 = por %p178_p2, %p177_p1 }
  0x28   : > { %200 = sbr.rel (%p652_p6) target bundleno = 67 (0x43), region = 20 }
  0x29   : > { %s1351_s7 = scalar_select %p1156_p5, 1, 0 }
  0x2b   : > { %1352 = sst [smem:[#allocation23_spill]] %s1351_s7 }
  0x2d   : > { %203 = sbr.rel (!%p1111_p3) target bundleno = 57 (0x39), region = 24  ;;  %s205_s28 = sand.u32 (%p1111_p3), 1, %s980_s22  }
  0x2e   : > { %s677_s6 = sshll.u32 (%p1111_p3), %s996_s26, 2  ;;  %s653_s5 = sshll.u32 (%p1111_p3), %s205_s28, 3 }
  0x2f   : > { %s210_s11 = sadd.s32 (%p1111_p3), %s992_s25, %s677_s6  ;;  %s1353_s0 = sld [smem:[#allocation24_spill]] (%p1111_p3) }
  0x30   : > { %s656_s13 = sshll.u32 (%p1111_p3), %s210_s11, 2  ;;  %s207_s9 = scalar_lea.vmem (%p1111_p3), [#allocation2], %s653_s5 }
  0x35   : > { %s212_s10 = scalar_lea.vmem %s1353_s0, %s656_s13 }
  0x36   : > { %v229_v0 = vld [vmem:[%s212_s10] sm:$0xf]  ;;  %v231_v1 = vld [vmem:[%s212_s10 + $0x8] sm:$0xf] }
  0x37   : > { %230 = vst [vmem:[%s207_s9] sm:$0xf] %v229_v0 }
  0x38   : > { %232 = vst [vmem:[%s207_s9 + $0x4] sm:$0xf] %v231_v1 }
  0x39 PF: > { %s261_s8 = sand.u32 1, %s972_s20   ;;  %s658_s17 = sshll.u32 %s992_s25, 3 }
  0x3a   : > { %s657_s22 = sshll.u32 %s261_s8, 7  ;;  %s272_s6 = scalar_lea.hbm %s1321_s1, %s658_s17 }
  0x3b   : > { %s273_s11 = sshll.u32 %s272_s6, 4  ;;  %s265_s7 = scalar_lea.vmem [#allocation3], %s657_s22  ;;  %s274_s11 = int_to_ptr.hbm [resolvable:$true] %s273_s11 }
  0x3c   : > { %s275_s29 = sshll.u32 %s265_s7, 4  ;;  %s262_s10 = scalar_lea.sflag [#allocation4], %s261_s8  ;;  %s276_s29 = int_to_ptr.vmem [resolvable:$true] %s275_s29 }
  0x3d   : > { %s1002_s5 = smov 256   ;;  %s1003_s9 = smov 128  }
  0x3e   : > { %s1004_s13 = smov 8   ;;  %s296_s25 = scalar_lea.hbm %s1322_s2, %s658_s17 }
  0x3f   : > { %680 = dma.hbm_to_vmem [thread:$0]  (%p1125_p7), %s274_s11, 2048, %s276_s29, %s262_s10, %s1002_s5, %s1003_s9, %s1004_s13  }
  0x40   : > { %s297_s20 = sshll.u32 %s296_s25, 4  ;;  %s289_s15 = scalar_lea.vmem [#allocation6], %s657_s22  ;;  %s298_s20 = int_to_ptr.hbm [resolvable:$true] %s297_s20 }
  0x41   : > { %s299_s26 = sshll.u32 %s289_s15, 4  ;;  %s286_s28 = scalar_lea.sflag [#allocation7], %s261_s8  ;;  %s300_s26 = int_to_ptr.vmem [resolvable:$true] %s299_s26 }
  0x42   : > { %681 = dma.hbm_to_vmem [thread:$0]  (%p1125_p7), %s298_s20, 2048, %s300_s26, %s286_s28, %s1002_s5, %s1003_s9, %s1004_s13  }
  0x43 PF: > { %p661_p3 = scmp.ge.s32.totalorder %s1000_s27, 1  ;;  %p307_p8 = scmp.lt.s32.totalorder %s1000_s27, 5 }
  0x45   : > { %p308_p9 = pnand %p661_p3, %p307_p8 }
  0x46   : > { %s314_s0 = sand.u32 (!%p308_p9), 1, %s976_s21   ;;  %s320_s17 = sand.u32 (!%p308_p9), 1, %s968_s19  }
  0x47   : > { %311 = sbr.rel (%p308_p9) target bundleno = 321 (0x141), region = 73  ;;  %s1185_s25 = sshll.u32 (!%p308_p9), %s314_s0, 3 }
  0x48   : > { %s663_s15 = sshll.u32 (!%p308_p9), %s320_s17, 7  ;;  %s316_s22 = scalar_lea.vmem (!%p308_p9), [#allocation2], %s1185_s25 }
  0x49   : > { %s321_s7 = scalar_lea.sflag (!%p308_p9), [#allocation4], %s320_s17  ;;  %s1188_s12 = scalar_lea.vmem (!%p308_p9), [#allocation3], %s663_s15 }
  0x4c   : > { %939 = dma.done.wait (%p1137_p12), %s321_s7, 2048  }
  0x4d   : > { %941 = vsyncadd (%p1137_p12), %s321_s7, 4294965248  ;;  %s331_s20 = scalar_lea.sflag [#allocation7], %s320_s17  ;;  %s1194_s8 = scalar_lea.vmem [#allocation6], %s663_s15 }
  0x4e   : > { %943 = dma.done.wait (%p1137_p12), %s331_s20, 2048  }
  0x4f   : > { %945 = vsyncadd (%p1137_p12), %s331_s20, 4294965248  ;;  %s369_s21 = sand.u32 1, %s956_s16   ;;  %p666_p7 = scmp.ne.s32.totalorder %s984_s23, 0 }
  0x50   : > { %s665_s6 = sshll.u32 %s369_s21, 4 }
  0x51   : > { %s1203_s11 = scalar_lea.vmem [#allocation8], %s665_s6  ;;  %382 = sbr.rel (%p666_p7) target bundleno = 89 (0x59), region = 89 }
  0x56   : > { %v1005_v2 = vmov 0.0  }
  0x57   : > { %383 = vst [vmem:[%s1203_s11] sm:$0xff] %v1005_v2 }
  0x58   : > { %384 = vst [vmem:[%s1203_s11 + $0x8] sm:$0xff] %v1005_v2 }
  0x59 PF: > { %v401_v3 = vld [vmem:[%s1188_s12 + $0x70] sm:$0xff]  ;;  %v402_v4 = vld [vmem:[%s1188_s12 + $0x78] sm:$0xff]  ;;  %v399_v9 = vld [vmem:[%s1188_s12 + $0x60] sm:$0xff]  ;;  %p671_p10 = scmp.ne.s32.totalorder %s984_s23, 1 }
  0x5a   : > { %v417_v5 = vld [vmem:[%s1194_s8 + $0x70] sm:$0xff]  ;;  %v418_v6 = vld [vmem:[%s1194_s8 + $0x78] sm:$0xff]  ;;  %v400_v10 = vld [vmem:[%s1188_s12 + $0x68] sm:$0xff] }
  0x5b   : > { %v433_v7 = vmul.f32 %v417_v5, %v401_v3  ;;  %v434_v8 = vmul.f32 %v418_v6, %v402_v4  ;;  %v415_v11 = vld [vmem:[%s1194_s8 + $0x60] sm:$0xff]  ;;  %v416_v12 = vld [vmem:[%s1194_s8 + $0x68] sm:$0xff]  ;;  %v397_v17 = vld [vmem:[%s1188_s12 + $0x50] sm:$0xff] }
  0x5c   : > { %v431_v14 = vmul.f32 %v415_v11, %v399_v9  ;;  %v432_v15 = vmul.f32 %v416_v12, %v400_v10  ;;  %v398_v18 = vld [vmem:[%s1188_s12 + $0x58] sm:$0xff]  ;;  %v413_v19 = vld [vmem:[%s1194_s8 + $0x50] sm:$0xff]  ;;  %v395_v24 = vld [vmem:[%s1188_s12 + $0x40] sm:$0xff] }
  0x5d   : > { %v442_v13 = vpack.c.bf16 %v434_v8, %v433_v7  ;;  %v414_v20 = vld [vmem:[%s1194_s8 + $0x58] sm:$0xff]  ;;  %v429_v21 = vmul.f32 %v413_v19, %v397_v17  ;;  %v396_v25 = vld [vmem:[%s1188_s12 + $0x48] sm:$0xff]  ;;  %v411_v26 = vld [vmem:[%s1194_s8 + $0x40] sm:$0xff] }
  0x5e   : > { %v441_v16 = vpack.c.bf16 %v432_v15, %v431_v14  ;;  %v430_v22 = vmul.f32 %v414_v20, %v398_v18  ;;  %v412_v27 = vld [vmem:[%s1194_s8 + $0x48] sm:$0xff]  ;;  %v427_v28 = vmul.f32 %v411_v26, %v395_v24  ;;  %v393_v31 = vld [vmem:[%s1188_s12 + $0x30] sm:$0xff]  ;;  %v394_v32 = vld [vmem:[%s1188_s12 + $0x38] sm:$0xff] }
  0x5f   : > { %451 = vmatpush.bf16.xpose.msra.mxu0 %v442_v13  ;;  %v428_v29 = vmul.f32 %v412_v27, %v396_v25  ;;  %v409_v33 = vld [vmem:[%s1194_s8 + $0x30] sm:$0xff]  ;;  %v410_v34 = vld [vmem:[%s1194_s8 + $0x38] sm:$0xff]  ;;  %v391_v38 = vld [vmem:[%s1188_s12 + $0x20] sm:$0xff] }
  0x60   : > { %v440_v23 = vpack.c.bf16 %v430_v22, %v429_v21  ;;  %v425_v35 = vmul.f32 %v409_v33, %v393_v31  ;;  %v426_v36 = vmul.f32 %v410_v34, %v394_v32  ;;  %v392_v39 = vld [vmem:[%s1188_s12 + $0x28] sm:$0xff]  ;;  %v407_v40 = vld [vmem:[%s1194_s8 + $0x20] sm:$0xff]  ;;  %v389_v45 = vld [vmem:[%s1188_s12 + $0x10] sm:$0xff] }
  0x61   : > { %v439_v30 = vpack.c.bf16 %v428_v29, %v427_v28  ;;  %v408_v41 = vld [vmem:[%s1194_s8 + $0x28] sm:$0xff]  ;;  %v423_v42 = vmul.f32 %v407_v40, %v391_v38  ;;  %v390_v46 = vld [vmem:[%s1188_s12 + $0x18] sm:$0xff]  ;;  %v405_v47 = vld [vmem:[%s1194_s8 + $0x10] sm:$0xff] }
  0x62   : > { %v438_v37 = vpack.c.bf16 %v426_v36, %v425_v35  ;;  %v424_v43 = vmul.f32 %v408_v41, %v392_v39  ;;  %v406_v48 = vld [vmem:[%s1194_s8 + $0x18] sm:$0xff]  ;;  %v421_v49 = vmul.f32 %v405_v47, %v389_v45  ;;  %v387_v52 = vld [vmem:[%s1188_s12] sm:$0xff]  ;;  %v388_v53 = vld [vmem:[%s1188_s12 + $0x8] sm:$0xff] }
  0x63   : > { %v422_v50 = vmul.f32 %v406_v48, %v390_v46  ;;  %v403_v54 = vld [vmem:[%s1194_s8] sm:$0xff]  ;;  %v404_v55 = vld [vmem:[%s1194_s8 + $0x8] sm:$0xff]  ;;  %v678_v59 = vld [vmem:[%s316_s22] sm:$0xff] }
  0x64   : > { %v437_v44 = vpack.c.bf16 %v424_v43, %v423_v42  ;;  %v419_v56 = vmul.f32 %v403_v54, %v387_v52  ;;  %v420_v57 = vmul.f32 %v404_v55, %v388_v53  ;;  %v443_v60 = vld [vmem:[%s1203_s11] sm:$0xff]  ;;  %v444_v63 = vld [vmem:[%s1203_s11 + $0x8] sm:$0xff] }
  0x65   : > { %v436_v51 = vpack.c.bf16 %v422_v50, %v421_v49 }
  0x66   : > { %v435_v58 = vpack.c.bf16 %v420_v57, %v419_v56 }
  0x67   : > { %452 = vmatpush.bf16.xpose.msra.mxu0 %v441_v16 }
  0x6f   : > { %453 = vmatpush.bf16.xpose.msra.mxu0 %v440_v23 }
  0x77   : > { %454 = vmatpush.bf16.xpose.msra.mxu0 %v439_v30 }
  0x7f   : > { %455 = vmatpush.bf16.xpose.msra.mxu0 %v438_v37 }
  0x87   : > { %456 = vmatpush.bf16.xpose.msra.mxu0 %v437_v44 }
  0x8f   : > { %457 = vmatpush.bf16.xpose.msra.mxu0 %v436_v51 }
  0x97   : > { %458 = vmatpush.bf16.xpose.msra.mxu0 %v435_v58 }
  0x9e   : > { %459 = vmatmul.bf16.vlgmr.msra.gmra.mxu0 %v678_v59 }
 0x11b   : > { %v460_v61 = vpop.f32.mrf.mxu0 }
 0x11c   : > { %v465_v62 = vadd.f32 %v460_v61, %v443_v60 }
 0x11e   : > { %467 = vst [vmem:[%s1203_s11] sm:$0xff] %v465_v62 }
 0x122   : > { %472 = sbr.rel (%p671_p10) target bundleno = 305 (0x131), region = 93 }
 0x123   : > { %v462_v0 = vpop.f32.mrf.mxu0 }
 0x124   : > { %v466_v1 = vadd.f32 %v462_v0, %v444_v63 }
 0x126   : > { %468 = vst [vmem:[%s1203_s11 + $0x8] sm:$0xff] %v466_v1 }
 0x127   : > { %v473_v2 = vld [vmem:[%s1203_s11] sm:$0xff] }
 0x128   : > { %v801_v3 = vld [vmem:[%s1323_s3] ss:$0 sm:$0xff] }
 0x129   : > { %v479_v5 = vadd.f32 %v801_v3, %v473_v2 }
 0x12b   : > { %481 = vst [vmem:[%s1203_s11] sm:$0xff] %v479_v5 }
 0x12d   : > { %v474_v4 = vld [vmem:[%s1203_s11 + $0x8] sm:$0xff] }
 0x12e   : > { %v480_v6 = vadd.f32 %v801_v3, %v474_v4 }
 0x130   : > { %482 = vst [vmem:[%s1203_s11 + $0x8] sm:$0xff] %v480_v6 }
 0x131 PF: > { %s679_s23 = sshll.u32 %s988_s24, 4  ;;  %s497_s13 = sshll.u32 %s1203_s11, 4  ;;  %s498_s13 = int_to_ptr.vmem [resolvable:$true] %s497_s13 }
 0x132   : > { %s496_s9 = scalar_lea.hbm %s1324_s4, %s679_s23  ;;  %s484_s26 = scalar_lea.sflag [#allocation5], %s369_s21 }
 0x133   : > { %s499_s14 = sshll.u32 %s496_s9, 4  ;;  %s878_s24 = scalar_lea.hbm %s1324_s4, 32  ;;  %s500_s14 = int_to_ptr.hbm [resolvable:$true] %s499_s14 }
 0x134   : > { %s872_s28 = sshra.s32 %s500_s14, 4  ;;  %s873_s28 = int_to_ptr.hbm [resolvable:$true] %s872_s28 }
 0x135   : > { %s874_s0 = scalar_lea.hbm %s873_s28, 16  ;;  %p879_p0 = scmp.lt.s32.totalorder %s873_s28, %s1324_s4 }
 0x136   : > { %p875_p11 = scmp.ne.s32.totalorder %s873_s28, %s874_s0  ;;  %p880_p1 = scmp.lt.s32.totalorder %s878_s24, %s874_s0 }
 0x138   : > { %p876_p12 = pnand %p875_p11, %p1152_p4  ;;  %p881_p2 = por %p880_p1, %p879_p0 }
 0x13a   : > { %p877_p13 = pneg %p876_p12 }
 0x13c   : > { %p882_p6 = pnand %p881_p2, %p877_p13 }
 0x13e   : > { %885 = shalt.err (!%p882_p6)
}
 0x13f   : > { %s1006_s7 = smov 128   ;;  %s1007_s12 = smov 8  }
 0x140   : > { %684 = dma.vmem_to_hbm [thread:$0]  (%p1152_p4), %s498_s13, 256, %s500_s14, %s484_s26, %s1006_s7, %s1006_s7, %s1007_s12  }
 0x141 PF: > { %s1354_s20 = sld [smem:[#allocation12_spill]]  ;;  %p690_p3 = scmp.ge.s32.totalorder %s1000_s27, 2 }
 0x143   : > { %p687_p8 = pnand %p690_p3, %p1156_p5 }
 0x145   : > { %p688_p9 = pneg %p687_p8 }
 0x147   : > { %s514_s21 = sand.u32 1, %s1354_s20  }
 0x148   : > { %s515_s6 = scalar_lea.sflag [#allocation5], %s514_s21 }
 0x149   : > { %947 = dma.done.wait (%p688_p9), %s515_s6, 256  }
 0x14a   : > { %949 = vsyncadd (%p688_p9), %s515_s6, 4294967040  ;;  %s23_s27 = sadd.s32 1, %s1000_s27   ;;  %s1357_s18 = sld [smem:[#allocation13_spill]] }
 0x14b   : > { %p1276_p7 = scmp.ge.s32.totalorder %s23_s27, 6   ;;  %s1358_s17 = sld [smem:[#allocation22_spill]] }
 0x14c   : > { %s1359_s30 = sld [smem:[#allocation14_spill]]  ;;  %s1367_s15 = smov %s956_s16 }
 0x14d   : > { %s1360_s20 = sld [smem:[#allocation20_spill]] }
 0x14e   : > { %s1361_s21 = sld [smem:[#allocation15_spill]] }
 0x14f   : > { %s1362_s22 = sld [smem:[#allocation21_spill]]  ;;  %22 = sbr.rel (!%p1276_p7) target bundleno = 14 (0xe), region = 154 }
 0x150   : > { %s1363_s23 = sld [smem:[#allocation16_spill]]  ;;  %s1368_s16 = smov %s1357_s18 }
 0x151   : > { %s1364_s24 = sld [smem:[#allocation17_spill]]  ;;  %s1369_s18 = smov %s968_s19 }
 0x152   : > { %s1365_s25 = sld [smem:[#allocation18_spill]]  ;;  %s1370_s19 = smov %s1359_s30 }
 0x153   : > { %s1366_s26 = sld [smem:[#allocation19_spill]] }
 0x154   :  { %521 = vsyncpa [#allocation4], 1 }
 0x155   :  { %523 = vsyncpa [#allocation4 + $0x1], 1 }
 0x156   :  { %524 = vsyncpa [#allocation7], 1 }
 0x157   :  { %526 = vsyncpa [#allocation7 + $0x1], 1 }
 0x158   :  { %527 = vsyncpa [#allocation5], 1 }
 0x159   :  { %529 = vsyncpa [#allocation5 + $0x1], 1 }

</bundles_post_ra>
